<compile_context>
chip_gen: v7x
topology: tpu7x:2x2x1
jax: 0.10.0
libtpu: 0.0.40
codegen_flags: <defaults>
</compile_context>

<pallas_src>
import functools

import jax
import jax.numpy as jnp
import numpy as np
from jax import lax
from jax.experimental import pallas as pl
from jax.experimental.pallas import tpu as pltpu

BN_EPS = 1e-5


def _graphsaint_kernel(x_ref, adj_ref, scale_ref, shift_ref, out_ref, h_ref,
                       *, row_tile: int, adj_resident: bool):
    """One grid step = (layer l, row tile i).

    x_ref     : (N, D)    f32   layer-0 embeddings (VMEM resident)
    adj_ref   : resident -> (N, N), streamed -> (T, N); bf16 or int8
                (int8 quantization scale is folded into scale_ref)
    scale_ref : (1, 1, D) f32   fused BN scale for layer l (incl. adj scale)
    shift_ref : (1, 1, D) f32   fused BN shift for layer l
    out_ref   : (N, D)    f32   resident accumulator: x + sum_l h_l
    h_ref     : (2, N, D) bf16  ping-pong layer activations (scratch)
    """
    l = pl.program_id(0)
    i = pl.program_id(1)
    n_layers = pl.num_programs(0)

    row0 = pl.multiple_of(i * row_tile, row_tile)
    rows = pl.ds(row0, row_tile)

    # ---- one-time init: cast layer-0 embeddings into the ping-pong buffer ---
    @pl.when((l == 0) & (i == 0))
    def _():
        h_ref[0] = x_ref[...].astype(jnp.bfloat16)

    src = lax.rem(l, 2)
    h_src = h_ref[src]                                     # (N, D) bf16

    if adj_resident:
        a = adj_ref[rows, :]                               # slice resident adj
    else:
        a = adj_ref[...]                                   # streamed row tile
    a = a.astype(jnp.bfloat16)                             # int8 -> bf16 (no-op for bf16)

    # ---- LightGCN propagation on the MXU (bf16 in, f32 accumulate) ----------
    h_new = jnp.dot(a, h_src, preferred_element_type=jnp.float32)

    # ---- fused BatchNorm1d(eval) + ReLU: one FMA + one max per element ------
    h_new = jnp.maximum(h_new * scale_ref[0] + shift_ref[0], 0.0)
    # Dropout -> identity in eval mode.
    # TODO(synk): keep h in f32 (VMEM permitting) for accuracy-critical runs.

    # feed the next layer (skip the store on the last layer)
    @pl.when(l + 1 < n_layers)
    def _():
        h_ref[1 - src, rows, :] = h_new.astype(jnp.bfloat16)

    # running sum over stacked layers (layer-0 x term fused into the first store)
    @pl.when(l == 0)
    def _():
        out_ref[rows, :] = x_ref[rows, :] + h_new

    @pl.when(l > 0)
    def _():
        out_ref[rows, :] += h_new


def build_norm_adj(edge_index: jnp.ndarray, num_nodes: int) -> jnp.ndarray:
    """Dense normalized adjacency matching LightGCNConv semantics.

    edge_index: (2, E) int32, row = source, col = target (PyG convention).
    out[c] = sum_{edges (r->c)} deg_inv_sqrt[r] * deg_inv_sqrt[c] * x[r]
    (degree is taken over the target column, as in the PyTorch module).
    """
    row, col = edge_index[0], edge_index[1]
    deg = jnp.zeros((num_nodes,), jnp.float32).at[col].add(1.0)
    deg_inv_sqrt = jnp.where(deg > 0, lax.rsqrt(jnp.maximum(deg, 1.0)), 0.0)
    norm = deg_inv_sqrt[row] * deg_inv_sqrt[col]           # (E,)
    adj = jnp.zeros((num_nodes, num_nodes), jnp.float32).at[col, row].add(norm)
    return adj


def _vmem_capacity_bytes() -> int:
    """Generation-aware VMEM capacity (fallback: v7x 64 MiB per TC)."""
    try:
        info = pltpu.get_tpu_info()
        cap = getattr(info, "vmem_capacity_bytes", None)
        if cap:
            return int(cap)
    except Exception:
        pass
    return 64 * 1024 * 1024


def graphsaint_forward(edge_index, params, *, num_users, num_items,
                       num_layers, node_norm=None, adj_mode=None):
    """adj_mode: None (auto) | 'resident_bf16' | 'resident_int8' | 'stream_int8'."""
    assert num_layers >= 1
    user_emb = params["user_embedding"]
    item_emb = params["item_embedding"]
    all_emb = jnp.concatenate([user_emb, item_emb], axis=0).astype(jnp.float32)
    n_nodes, dim = all_emb.shape

    # Glue: densify the sampled sub-graph into a normalized adjacency.
    # TODO(synk): keep the aggregation sparse (CSR offsets via scalar prefetch
    #             + gathered DMA) and cache adj across calls when E << N^2.
    adj = build_norm_adj(edge_index, n_nodes)

    # Pad node count up to a multiple of 128 (no more row_tile=n_nodes
    # fallback).  Padded rows/cols are zero -> they never affect real nodes
    # and are sliced off at the end.
    n_pad = ((n_nodes + 127) // 128) * 128
    pad = n_pad - n_nodes
    if pad:
        adj = jnp.pad(adj, ((0, pad), (0, pad)))
        x = jnp.pad(all_emb, ((0, pad), (0, 0)))
    else:
        x = all_emb

    # Row tiling: biggest power-of-two tile (>=128) dividing n_pad.
    row_tile = 128
    for cand in (1024, 512, 256):
        if n_pad % cand == 0:
            row_tile = cand
            break

    # ---- generation-aware VMEM budget ---------------------------------------
    vmem_cap = _vmem_capacity_bytes()
    budget = max(int(0.8 * vmem_cap), 32 * 1024 * 1024)

    def vmem_need(adj_elem_bytes, resident, tile):
        need = 2 * n_pad * dim * 4                       # x resident f32 (x2 slack)
        need += 2 * n_pad * dim * 4                      # out resident f32 (x2 slack)
        need += 2 * n_pad * dim * 2                      # h ping-pong scratch bf16
        need += 64 * 1024                                # per-layer BN scale/shift blocks
        if resident:
            need += 2 * n_pad * n_pad * adj_elem_bytes   # resident adj (x2 slack)
        else:
            need += 2 * tile * n_pad * adj_elem_bytes    # streamed adj, double-buffered
        return need + (2 << 20)                          # headroom

    if adj_mode is None:
        if vmem_need(2, True, row_tile) <= budget:
            adj_mode = "resident_bf16"       # adj read from HBM once, MXU-bound
        elif vmem_need(1, True, row_tile) <= budget:
            adj_mode = "resident_int8"       # int8 residency doubles the threshold
        else:
            adj_mode = "stream_int8"         # mem-bound: halve the dominant stream

    adj_resident = adj_mode.startswith("resident")
    adj_int8 = adj_mode.endswith("int8")

    if not adj_resident:
        while row_tile > 128 and vmem_need(1 if adj_int8 else 2, False, row_tile) > budget:
            row_tile //= 2

    need = vmem_need(1 if adj_int8 else 2, adj_resident, row_tile)
    if need > budget:
        raise ValueError(
            f"GraphSAINT kernel needs ~{need / 2**20:.1f} MiB VMEM, exceeding the "
            f"~{budget / 2**20:.0f} MiB budget on this TPU; sample a smaller sub-graph.")
    vmem_limit = int(min(max(need, 32 * 1024 * 1024), budget))
    n_row_tiles = n_pad // row_tile

    # ---- adjacency compression (for the HBM-BW-bound regime) ----------------
    if adj_int8:
        # Per-matrix symmetric int8; scale folded into the fused BN scale.
        # TODO(synk): native fp8 (e4m3) straight into the v7x MXU.
        a_max = jnp.maximum(jnp.max(jnp.abs(adj)), 1e-12)
        adj_scale = (a_max / 127.0).astype(jnp.float32)
        adj_q = jnp.clip(jnp.round(adj / adj_scale), -127.0, 127.0).astype(jnp.int8)
    else:
        adj_scale = jnp.float32(1.0)
        adj_q = adj.astype(jnp.bfloat16)

    # Fused BatchNorm1d (eval): h * scale + shift, adj quant scale folded in.
    scale = params["bn_gamma"] * lax.rsqrt(params["bn_var"] + BN_EPS)
    shift = params["bn_beta"] - params["bn_mean"] * scale
    scale = (scale * adj_scale).reshape(num_layers, 1, dim).astype(jnp.float32)
    shift = shift.reshape(num_layers, 1, dim).astype(jnp.float32)

    if adj_resident:
        adj_spec = pl.BlockSpec((n_pad, n_pad), lambda l, i: (0, 0))
    else:
        adj_spec = pl.BlockSpec((row_tile, n_pad), lambda l, i: (i, 0))
        # TODO(synk): pipeline_mode=pl.Buffered(3) on adj for v5e when VMEM allows.

    kernel = functools.partial(_graphsaint_kernel, row_tile=row_tile,
                               adj_resident=adj_resident)

    out_sum = pl.pallas_call(
        kernel,
        out_shape=jax.ShapeDtypeStruct((n_pad, dim), jnp.float32),
        grid_spec=pltpu.PrefetchScalarGridSpec(
            num_scalar_prefetch=0,
            grid=(num_layers, n_row_tiles),
            in_specs=[
                pl.BlockSpec((n_pad, dim), lambda l, i: (0, 0)),      # x (resident)
                adj_spec,                                             # adjacency
                pl.BlockSpec((1, 1, dim), lambda l, i: (l, 0, 0)),    # BN scale (layer l)
                pl.BlockSpec((1, 1, dim), lambda l, i: (l, 0, 0)),    # BN shift (layer l)
            ],
            out_specs=pl.BlockSpec((n_pad, dim), lambda l, i: (0, 0)),  # resident acc
            scratch_shapes=[pltpu.VMEM((2, n_pad, dim), jnp.bfloat16)],
        ),
        compiler_params=pltpu.CompilerParams(
            # Layer recurrence over a shared scratch => both axes sequential.
            # TODO(synk): for v7x 2-TC use, batch independent sampled sub-graphs
            #             on a leading "parallel" grid axis.
            dimension_semantics=("arbitrary", "arbitrary"),
            vmem_limit_bytes=vmem_limit,
        ),
    )(x, adj_q, scale, shift)

    # Mean over (L+1) layers + GraphSAINT node_norm as trivially fused XLA
    # elementwise (avoids a lane-padded (N,1) resident VMEM block in-kernel).
    final = out_sum[:n_nodes] * (1.0 / float(num_layers + 1))
    if node_norm is not None:
        final = final * node_norm.reshape(n_nodes, 1).astype(jnp.float32)
    return final[:num_users], final[num_users:]


def graphsaint_reference(edge_index, params, *, num_users, num_items,
                         num_layers, node_norm=None):
    """Pure-JAX f32 reference mirroring the PyTorch forward (eval mode)."""
    all_emb = jnp.concatenate(
        [params["user_embedding"], params["item_embedding"]], axis=0)
    n_nodes = all_emb.shape[0]
    adj = build_norm_adj(edge_index, n_nodes)
    layers = [all_emb]
    h = all_emb
    for l in range(num_layers):
        h = adj @ h
        inv = lax.rsqrt(params["bn_var"][l] + BN_EPS)
        h = (h - params["bn_mean"][l]) * inv * params["bn_gamma"][l] + params["bn_beta"][l]
        h = jnp.maximum(h, 0.0)
        layers.append(h)
    final = jnp.mean(jnp.stack(layers), axis=0)
    if node_norm is not None:
        final = final * node_norm.reshape(-1, 1)
    return final[:num_users], final[num_users:]


def init_params(key, num_users, num_items, embedding_dim, num_layers):
    k_u, k_i = jax.random.split(key)
    # xavier_normal_: std = sqrt(2 / (fan_in + fan_out))
    std_u = float(np.sqrt(2.0 / (num_users + embedding_dim)))
    std_i = float(np.sqrt(2.0 / (num_items + embedding_dim)))
    return {
        "user_embedding": std_u * jax.random.normal(
            k_u, (num_users, embedding_dim), jnp.float32),
        "item_embedding": std_i * jax.random.normal(
            k_i, (num_items, embedding_dim), jnp.float32),
        # BatchNorm1d defaults: gamma=1, beta=0, running_mean=0, running_var=1
        "bn_gamma": jnp.ones((num_layers, embedding_dim), jnp.float32),
        "bn_beta": jnp.zeros((num_layers, embedding_dim), jnp.float32),
        "bn_mean": jnp.zeros((num_layers, embedding_dim), jnp.float32),
        "bn_var": jnp.ones((num_layers, embedding_dim), jnp.float32),
    }


if __name__ == "__main__":
    num_users, num_items = 48, 80          # N = 128 total nodes
    embedding_dim = 128
    num_layers = 3
    num_edges = 256
    n_nodes = num_users + num_items

    key = jax.random.PRNGKey(0)
    k_params, k_edges, k_norm = jax.random.split(key, 3)

    params = init_params(k_params, num_users, num_items, embedding_dim, num_layers)

    edge_index = jax.random.randint(
        k_edges, (2, num_edges), minval=0, maxval=n_nodes, dtype=jnp.int32)
    node_norm = jax.random.uniform(
        k_norm, (n_nodes,), jnp.float32, minval=0.5, maxval=1.5)

    user_ref, item_ref = graphsaint_reference(
        edge_index, params, num_users=num_users, num_items=num_items,
        num_layers=num_layers, node_norm=node_norm)

    # 1) Auto path (resident bf16 adjacency at this size, MXU-bound).
    user_out, item_out = graphsaint_forward(
        edge_index, params, num_users=num_users, num_items=num_items,
        num_layers=num_layers, node_norm=node_norm)
    jax.block_until_ready((user_out, item_out))
    np.testing.assert_allclose(np.asarray(user_out), np.asarray(user_ref),
                               rtol=2e-2, atol=2e-3)
    np.testing.assert_allclose(np.asarray(item_out), np.asarray(item_ref),
                               rtol=2e-2, atol=2e-3)

    # 2) Forced streaming int8 path (the large-N / HBM-bound configuration),
    #    looser tolerance due to the 8-bit adjacency quantization.
    user_q, item_q = graphsaint_forward(
        edge_index, params, num_users=num_users, num_items=num_items,
        num_layers=num_layers, node_norm=node_norm, adj_mode="stream_int8")
    jax.block_until_ready((user_q, item_q))
    np.testing.assert_allclose(np.asarray(user_q), np.asarray(user_ref),
                               rtol=5e-2, atol=1e-2)
    np.testing.assert_allclose(np.asarray(item_q), np.asarray(item_ref),
                               rtol=5e-2, atol=1e-2)

    print("KERNEL_OK")
</pallas_src>

<mosaic_0001>
module attributes {stable_mosaic.version = 11 : i64} {
  func.func @_graphsaint_kernel(%arg0: i32, %arg1: i32, %arg2: memref<128x128xf32, #tpu.memory_space<vmem>>, %arg3: memref<128x128xbf16, #tpu.memory_space<vmem>>, %arg4: memref<1x1x128xf32, #tpu.memory_space<vmem>>, %arg5: memref<1x1x128xf32, #tpu.memory_space<vmem>>, %arg6: memref<128x128xf32, #tpu.memory_space<vmem>>, %arg7: memref<2x128x128xbf16, #tpu.memory_space<vmem>>) attributes {dimension_semantics = [#tpu.dimension_semantics<arbitrary>, #tpu.dimension_semantics<arbitrary>], iteration_bounds = array<i64: 3, 1>, scalar_prefetch = 0 : i64, scratch_operands = 1 : i64, tpu.core_type = #tpu.core_type<tc>, window_params = [{pipeline_mode = #tpu.pipeline_mode<synchronous>, transform_indices = @transform_0, window_bounds = array<i64: 128, 128>}, {pipeline_mode = #tpu.pipeline_mode<synchronous>, transform_indices = @transform_1, window_bounds = array<i64: 128, 128>}, {transform_indices = @transform_2, window_bounds = array<i64: 1, 1, 128>}, {transform_indices = @transform_3, window_bounds = array<i64: 1, 1, 128>}, {pipeline_mode = #tpu.pipeline_mode<synchronous>, transform_indices = @transform_4, window_bounds = array<i64: 128, 128>}]} {
    %c128_i32 = arith.constant 128 : i32
    %0 = arith.muli %arg1, %c128_i32 : i32
    %1 = tpu.assume_multiple %0, 128 : i32
    %c0_i32 = arith.constant 0 : i32
    %2 = arith.cmpi eq, %arg0, %c0_i32 : i32
    %c0_i32_0 = arith.constant 0 : i32
    %3 = arith.cmpi eq, %arg1, %c0_i32_0 : i32
    %4 = arith.andi %2, %3 : i1
    %5 = arith.extui %4 : i1 to i32
    %c0_i32_1 = arith.constant 0 : i32
    %6 = arith.cmpi ne, %5, %c0_i32_1 : i32
    scf.if %6 {
      %c0_16 = arith.constant 0 : index
      %c0_17 = arith.constant 0 : index
      %34 = vector.load %arg2[%c0_16, %c0_17] : memref<128x128xf32, #tpu.memory_space<vmem>>, vector<128x128xf32>
      %35 = arith.truncf %34 : vector<128x128xf32> to vector<128x128xbf16>
      %c0_18 = arith.constant 0 : index
      %c0_19 = arith.constant 0 : index
      %c0_20 = arith.constant 0 : index
      %36 = vector.load %arg7[%c0_18, %c0_19, %c0_20] : memref<2x128x128xbf16, #tpu.memory_space<vmem>>, vector<1x128x128xbf16>
      %37 = vector.shape_cast %36 : vector<1x128x128xbf16> to vector<128x128xbf16>
      %38 = vector.shape_cast %35 : vector<128x128xbf16> to vector<1x128x128xbf16>
      tpu.vector_store %arg7[%c0_18, %c0_19, %c0_20], %38 {strides = array<i32>} : memref<2x128x128xbf16, #tpu.memory_space<vmem>>, vector<1x128x128xbf16>,
    } else {
    }
    %c2_i32 = arith.constant 2 : i32
    %7 = arith.remsi %arg0, %c2_i32 : i32
    %8 = arith.index_cast %7 : i32 to index
    %c0 = arith.constant 0 : index
    %c0_2 = arith.constant 0 : index
    %9 = vector.load %arg7[%8, %c0, %c0_2] : memref<2x128x128xbf16, #tpu.memory_space<vmem>>, vector<1x128x128xbf16>
    %10 = vector.shape_cast %9 : vector<1x128x128xbf16> to vector<128x128xbf16>
    %11 = arith.index_cast %1 : i32 to index
    %c0_3 = arith.constant 0 : index
    %12 = vector.load %arg3[%11, %c0_3] : memref<128x128xbf16, #tpu.memory_space<vmem>>, vector<128x128xbf16>
    %cst = arith.constant dense<0.000000e+00> : vector<128x128xf32>
    %13 = tpu.matmul %12, %10, %cst {dimension_numbers = #tpu.dot_dimension_numbers<[1], [0], [0], [1], [0, 0, 1, 1], [], []>} : vector<128x128xbf16>, vector<128x128xbf16>, vector<128x128xf32> -> vector<128x128xf32>
    %c0_4 = arith.constant 0 : index
    %c0_5 = arith.constant 0 : index
    %c0_6 = arith.constant 0 : index
    %14 = vector.load %arg4[%c0_4, %c0_5, %c0_6] : memref<1x1x128xf32, #tpu.memory_space<vmem>>, vector<1x1x128xf32>
    %15 = vector.shape_cast %14 : vector<1x1x128xf32> to vector<1x128xf32>
    %16 = vector.broadcast %15 : vector<1x128xf32> to vector<128x128xf32>
    %17 = arith.mulf %13, %16 : vector<128x128xf32>
    %c0_7 = arith.constant 0 : index
    %c0_8 = arith.constant 0 : index
    %c0_9 = arith.constant 0 : index
    %18 = vector.load %arg5[%c0_7, %c0_8, %c0_9] : memref<1x1x128xf32, #tpu.memory_space<vmem>>, vector<1x1x128xf32>
    %19 = vector.shape_cast %18 : vector<1x1x128xf32> to vector<1x128xf32>
    %20 = vector.broadcast %19 : vector<1x128xf32> to vector<128x128xf32>
    %21 = arith.addf %17, %20 : vector<128x128xf32>
    %cst_10 = arith.constant 0.000000e+00 : f32
    %22 = vector.broadcast %cst_10 : f32 to vector<128x128xf32>
    %23 = arith.maximumf %21, %22 : vector<128x128xf32>
    %c1_i32 = arith.constant 1 : i32
    %24 = arith.addi %arg0, %c1_i32 : i32
    %c3_i32 = arith.constant 3 : i32
    %25 = arith.cmpi slt, %24, %c3_i32 : i32
    %26 = arith.extui %25 : i1 to i32
    %c0_i32_11 = arith.constant 0 : i32
    %27 = arith.cmpi ne, %26, %c0_i32_11 : i32
    scf.if %27 {
      %34 = arith.truncf %23 : vector<128x128xf32> to vector<128x128xbf16>
      %c1_i32_16 = arith.constant 1 : i32
      %35 = arith.subi %c1_i32_16, %7 : i32
      %36 = arith.index_cast %35 : i32 to index
      %37 = arith.index_cast %1 : i32 to index
      %c0_17 = arith.constant 0 : index
      %38 = vector.load %arg7[%36, %37, %c0_17] : memref<2x128x128xbf16, #tpu.memory_space<vmem>>, vector<1x128x128xbf16>
      %39 = vector.shape_cast %38 : vector<1x128x128xbf16> to vector<128x128xbf16>
      %40 = vector.shape_cast %34 : vector<128x128xbf16> to vector<1x128x128xbf16>
      tpu.vector_store %arg7[%36, %37, %c0_17], %40 {strides = array<i32>} : memref<2x128x128xbf16, #tpu.memory_space<vmem>>, vector<1x128x128xbf16>,
    } else {
    }
    %c0_i32_12 = arith.constant 0 : i32
    %28 = arith.cmpi eq, %arg0, %c0_i32_12 : i32
    %29 = arith.extui %28 : i1 to i32
    %c0_i32_13 = arith.constant 0 : i32
    %30 = arith.cmpi ne, %29, %c0_i32_13 : i32
    scf.if %30 {
      %34 = arith.index_cast %1 : i32 to index
      %c0_16 = arith.constant 0 : index
      %35 = vector.load %arg2[%34, %c0_16] : memref<128x128xf32, #tpu.memory_space<vmem>>, vector<128x128xf32>
      %36 = arith.addf %35, %23 : vector<128x128xf32>
      %37 = arith.index_cast %1 : i32 to index
      %c0_17 = arith.constant 0 : index
      %38 = vector.load %arg6[%37, %c0_17] : memref<128x128xf32, #tpu.memory_space<vmem>>, vector<128x128xf32>
      tpu.vector_store %arg6[%37, %c0_17], %36 {strides = array<i32>} : memref<128x128xf32, #tpu.memory_space<vmem>>, vector<128x128xf32>,
    } else {
    }
    %c0_i32_14 = arith.constant 0 : i32
    %31 = arith.cmpi sgt, %arg0, %c0_i32_14 : i32
    %32 = arith.extui %31 : i1 to i32
    %c0_i32_15 = arith.constant 0 : i32
    %33 = arith.cmpi ne, %32, %c0_i32_15 : i32
    scf.if %33 {
      %34 = arith.index_cast %1 : i32 to index
      %c0_16 = arith.constant 0 : index
      %35 = vector.load %arg6[%34, %c0_16] : memref<128x128xf32, #tpu.memory_space<vmem>>, vector<128x128xf32>
      %36 = arith.addf %35, %23 : vector<128x128xf32>
      %37 = arith.index_cast %1 : i32 to index
      %c0_17 = arith.constant 0 : index
      %38 = vector.load %arg6[%37, %c0_17] : memref<128x128xf32, #tpu.memory_space<vmem>>, vector<128x128xf32>
      tpu.vector_store %arg6[%37, %c0_17], %36 {strides = array<i32>} : memref<128x128xf32, #tpu.memory_space<vmem>>, vector<128x128xf32>,
    } else {
    }
    return
  }
  func.func @transform_0(%arg0: i32, %arg1: i32) -> (i32, i32) {
    %c0_i32 = arith.constant 0 : i32
    %c0_i32_0 = arith.constant 0 : i32
    %c0_i32_1 = arith.constant 0 : i32
    return %c0_i32, %c0_i32_0 : i32, i32
  }
  func.func @transform_1(%arg0: i32, %arg1: i32) -> (i32, i32) {
    %c0_i32 = arith.constant 0 : i32
    %c0_i32_0 = arith.constant 0 : i32
    %c0_i32_1 = arith.constant 0 : i32
    return %c0_i32, %c0_i32_0 : i32, i32
  }
  func.func @transform_2(%arg0: i32, %arg1: i32) -> (i32, i32, i32) {
    %c0_i32 = arith.constant 0 : i32
    %c0_i32_0 = arith.constant 0 : i32
    %c0_i32_1 = arith.constant 0 : i32
    return %arg0, %c0_i32, %c0_i32_0 : i32, i32, i32
  }
  func.func @transform_3(%arg0: i32, %arg1: i32) -> (i32, i32, i32) {
    %c0_i32 = arith.constant 0 : i32
    %c0_i32_0 = arith.constant 0 : i32
    %c0_i32_1 = arith.constant 0 : i32
    return %arg0, %c0_i32, %c0_i32_0 : i32, i32, i32
  }
  func.func @transform_4(%arg0: i32, %arg1: i32) -> (i32, i32) {
    %c0_i32 = arith.constant 0 : i32
    %c0_i32_0 = arith.constant 0 : i32
    %c0_i32_1 = arith.constant 0 : i32
    return %c0_i32, %c0_i32_0 : i32, i32
  }
}

</mosaic_0001>

<bundles_post_ra>
// kernel: tpu_custom_call.1
= control target key start
LH: loop header
LB: loop body
LE: loop exit
PB: predicated region body
PF: predicated region fallthrough
CT: control target
= control target key end

     0   :  { %9 = vsyncpa [#allocation4], 0  ;;  %s1327_s0 = inlined_call_operand.hbm [shape: f32[128,128], index: 0, kind: input, shape index: {}]   ;;  %s1328_s1 = inlined_call_operand.hbm [shape: bf16[128,128], index: 1, kind: input, shape index: {}]   ;;  %s1329_s2 = inlined_call_operand.vmem [shape: f32[3,1,128], index: 2, kind: input, shape index: {}]   ;;  %s1330_s3 = inlined_call_operand.vmem [shape: f32[3,1,128], index: 3, kind: input, shape index: {}]   ;;  %s1331_s4 = inlined_call_operand.hbm [shape: f32[128,128], index: 4, kind: output, shape index: {}]  }
   0x1   :  { %10 = vsyncpa [#allocation7], 0 }
   0x2   :  { %11 = vsyncpa [#allocation5], 0  ;;  %s1067_s15 = smov 0   ;;  %s1069_s16 = smov 0  }
   0x3   :  { %s1071_s17 = smov 0  }
   0x4 LB: > { %s751_s18 = sadd.s32 4294967295, %s1031_s17   ;;  %s29_s19 = sadd.s32 1, %s1027_s16  ;;  %s1031_s17 = sphi %s1071_s17, %s17_s17   ;;  %s1027_s16 = sphi %s1069_s16, %s1342_s16   ;;  %s1023_s15 = sphi %s1067_s15, %s1341_s15  }
   0x5   : > { %p31_p0 = scmp.ge.s32.totalorder %s29_s19, 3  ;;  %p752_p1 = scmp.ge.s32.totalorder %s1031_s17, 1 }
   0x6   : > { %p149_p2 = scmp.lt.s32.totalorder %s1031_s17, 4  ;;  %p1094_p4 = scmp.eq.s32.totalorder %s751_s18, 0 }
   0x7   : > { %s1344_s19 = smov (%p31_p0, %s29_s19), 0  ;;  %s1033_s22 = smov [#allocation3]  }
   0x8   : > { %p1088_p3 = pnand %p752_p1, %p149_p2  ;;  %s161_s23 = sshll.u32 %s1033_s22, 4  ;;  %s162_s23 = int_to_ptr.vmem [resolvable:$true] %s161_s23 }
   0x9   : > { %s1336_s21 = scalar_select %p1094_p4, 1, 0 }
   0xa   : > { %s1335_s20 = scalar_select %p1088_p3, 1, 0 }
   0xb   : > { %p861_p5 = pneg %p1088_p3  ;;  %s1034_s25 = smov [#allocation6]  }
   0xc   : > { %s174_s26 = sshll.u32 %s1034_s25, 4  ;;  %s915_s29 = scalar_lea.hbm %s1327_s0, 2048  ;;  %s1106_s26 = int_to_ptr.vmem [resolvable:$true] %s174_s26 }
   0xd   : > { %p1102_p6 = pnand %p1094_p4, %p861_p5  ;;  %p916_p7 = scmp.ne.s32.totalorder %s1327_s0, %s915_s29 }
   0xe   : > { %p922_p11 = scmp.lt.u32.totalorder %s915_s29, %s1327_s0 }
   0xf   : > { %p917_p8 = pneg %p1102_p6 }
  0x11   : > { %p918_p9 = pnand %p917_p8, %p916_p7 }
  0x13   : > { %p919_p10 = pneg %p918_p9 }
  0x15   : > { %p924_p12 = pnand %p922_p11, %p919_p10 }
  0x17   : > { %927 = shalt.err (!%p924_p12)
}
  0x18   : > { %s928_s8 = scalar_lea.vmem %s162_s23, 2048  ;;  %p936_p2 = scmp.lt.s32.totalorder %s162_s23, %s162_s23 }
  0x19   : > { %p929_p13 = scmp.ne.s32.totalorder %s162_s23, %s928_s8  ;;  %p937_p5 = scmp.lt.s32.totalorder %s928_s8, %s928_s8 }
  0x1b   : > { %p931_p0 = pnand %p929_p13, %p917_p8  ;;  %p938_p4 = por %p937_p5, %p936_p2 }
  0x1d   : > { %p932_p1 = pneg %p931_p0 }
  0x1f   : > { %p939_p3 = pnand %p938_p4, %p932_p1 }
  0x21   : > { %942 = shalt.err (!%p939_p3)
}
  0x22   : > { %s1035_s9 = smov 128   ;;  %s1036_s10 = smov 8  }
  0x23   : > { %864 = dma.hbm_to_vmem [thread:$0]  (!%p1102_p6), %s1327_s0, 2048, %s162_s23, [#allocation4], %s1035_s9, %s1035_s9, %s1036_s10  }
  0x24   : > { %s943_s22 = scalar_lea.hbm %s1328_s1, 1024 }
  0x25   : > { %p944_p7 = scmp.ne.s32.totalorder %s1328_s1, %s943_s22  ;;  %p950_p9 = scmp.lt.u32.totalorder %s943_s22, %s1328_s1 }
  0x27   : > { %p946_p3 = pnand %p944_p7, %p917_p8 }
  0x29   : > { %p947_p4 = pneg %p946_p3 }
  0x2b   : > { %p952_p10 = pnand %p950_p9, %p947_p4 }
  0x2d   : > { %955 = shalt.err (!%p952_p10)
}
  0x2e   : > { %s956_s23 = scalar_lea.vmem %s1106_s26, 1024  ;;  %p964_p0 = scmp.lt.s32.totalorder %s1106_s26, %s1106_s26 }
  0x2f   : > { %p957_p11 = scmp.ne.s32.totalorder %s1106_s26, %s956_s23  ;;  %p965_p1 = scmp.lt.s32.totalorder %s956_s23, %s956_s23 }
  0x31   : > { %p959_p12 = pnand %p957_p11, %p917_p8  ;;  %p966_p2 = por %p965_p1, %p964_p0 }
  0x33   : > { %p960_p13 = pneg %p959_p12 }
  0x35   : > { %p967_p5 = pnand %p966_p2, %p960_p13 }
  0x37   : > { %970 = shalt.err (!%p967_p5)
}
  0x38   : > { %s1037_s30 = smov 64   ;;  %s1038_s5 = smov 4  }
  0x39   : > { %867 = dma.hbm_to_vmem [thread:$0]  (!%p1102_p6), %s1328_s1, 1024, %s1106_s26, [#allocation7], %s1037_s30, %s1037_s30, %s1038_s5  }
  0x3a   : > { %p1338_p7 = scmp.ne.s32.totalorder %s1335_s20, 0 }
  0x3b   : > { %p1339_p8 = scmp.ne.s32.totalorder (!%p1338_p7), %s1336_s21, 0 }
  0x3c   : > { %202 = sbr.rel (%p1338_p7) target bundleno = 405 (0x195), region = 36 }
  0x43   : > { %1010 = dma.done.wait (%p1339_p8), [#allocation4], 2048  }
  0x44   : > { %1012 = vsyncadd (%p1339_p8), [#allocation4], 4294965248 }
  0x45   : > { %1014 = dma.done.wait (%p1339_p8), [#allocation7], 1024  }
  0x46   : > { %1016 = vsyncadd (%p1339_p8), [#allocation7], 4294966272  ;;  %p228_p3 = scmp.lt.s32.totalorder %s1023_s15, 2  ;;  %p236_p6 = scmp.eq.s32.totalorder %s1023_s15, 0 }
  0x47   : > { %v242_v0 = vld [vmem:[#allocation3] sm:$0xff] (%p236_p6)  ;;  %v243_v1 = vld [vmem:[#allocation3 + $0x8] sm:$0xff] (%p236_p6)  ;;  %v244_v2 = vld [vmem:[#allocation3 + $0x10] sm:$0xff] (%p236_p6) }
  0x48   : > { %s1168_s24 = scalar_select %p228_p3, %s1023_s15, 2 }
  0x49   : > { %241 = sbr.rel (!%p236_p6) target bundleno = 81 (0x51), region = 48  ;;  %v258_v3 = vpack.c.bf16 (%p236_p6), %v243_v1, %v242_v0  ;;  %v245_v4 = vld [vmem:[#allocation3 + $0x18] sm:$0xff] (%p236_p6)  ;;  %v246_v5 = vld [vmem:[#allocation3 + $0x20] sm:$0xff] (%p236_p6)  ;;  %v247_v6 = vld [vmem:[#allocation3 + $0x28] sm:$0xff] (%p236_p6) }
  0x4a   : > { %s230_s8 = scalar_lea.vmem %s1329_s2, %s1168_s24  ;;  %s233_s11 = scalar_lea.vmem %s1330_s3, %s1168_s24  ;;  %v259_v7 = vpack.c.bf16 (%p236_p6), %v245_v4, %v244_v2  ;;  %v260_v8 = vpack.c.bf16 (%p236_p6), %v247_v6, %v246_v5  ;;  %v248_v9 = vld [vmem:[#allocation3 + $0x30] sm:$0xff] (%p236_p6)  ;;  %v249_v10 = vld [vmem:[#allocation3 + $0x38] sm:$0xff] (%p236_p6)  ;;  %v250_v11 = vld [vmem:[#allocation3 + $0x40] sm:$0xff] (%p236_p6) }
  0x4b   : > { %266 = vst [vmem:[#allocation2] sm:$0xff] (%p236_p6), %v258_v3  ;;  %v261_v12 = vpack.c.bf16 (%p236_p6), %v249_v10, %v248_v9  ;;  %v251_v13 = vld [vmem:[#allocation3 + $0x48] sm:$0xff] (%p236_p6)  ;;  %v252_v14 = vld [vmem:[#allocation3 + $0x50] sm:$0xff] (%p236_p6)  ;;  %v253_v15 = vld [vmem:[#allocation3 + $0x58] sm:$0xff] (%p236_p6) }
  0x4c   : > { %267 = vst [vmem:[#allocation2 + $0x8] sm:$0xff] (%p236_p6), %v259_v7  ;;  %268 = vst [vmem:[#allocation2 + $0x10] sm:$0xff] (%p236_p6), %v260_v8  ;;  %v262_v16 = vpack.c.bf16 (%p236_p6), %v251_v13, %v250_v11  ;;  %v263_v17 = vpack.c.bf16 (%p236_p6), %v253_v15, %v252_v14  ;;  %v254_v18 = vld [vmem:[#allocation3 + $0x60] sm:$0xff] (%p236_p6)  ;;  %v255_v19 = vld [vmem:[#allocation3 + $0x68] sm:$0xff] (%p236_p6) }
  0x4d   : > { %v256_v20 = vld [vmem:[#allocation3 + $0x70] sm:$0xff] (%p236_p6)  ;;  %269 = vst [vmem:[#allocation2 + $0x18] sm:$0xff] (%p236_p6), %v261_v12  ;;  %v264_v21 = vpack.c.bf16 (%p236_p6), %v255_v19, %v254_v18  ;;  %v257_v22 = vld [vmem:[#allocation3 + $0x78] sm:$0xff] (%p236_p6) }
  0x4e   : > { %270 = vst [vmem:[#allocation2 + $0x20] sm:$0xff] (%p236_p6), %v262_v16  ;;  %271 = vst [vmem:[#allocation2 + $0x28] sm:$0xff] (%p236_p6), %v263_v17  ;;  %v265_v23 = vpack.c.bf16 (%p236_p6), %v257_v22, %v256_v20 }
  0x4f   : > { %272 = vst [vmem:[#allocation2 + $0x30] sm:$0xff] (%p236_p6), %v264_v21 }
  0x50   : > { %273 = vst [vmem:[#allocation2 + $0x38] sm:$0xff] %v265_v23 }
  0x51 PF: > { %p274_p4 = scmp.lt.s32.totalorder %s1023_s15, 0  ;;  %s275_s21 = ssub.s32 0, %s1023_s15  ;;  %v907_v24 = vld [vmem:[#allocation6] sm:$0xff]   ;;  %v909_v34 = vld [vmem:[#allocation6 + $0x8] sm:$0xff]   ;;  %v911_v36 = vld [vmem:[#allocation6 + $0x10] sm:$0xff]  }
  0x52   : > { %s760_s12 = smin.u32 %s1023_s15, %s275_s21  ;;  %v908_v25 = vld [vmem:[#allocation6 + $0x20] sm:$0xff]   ;;  %817 = vmatprep.mubr.bf16.mxu0 %v907_v24  ;;  %v910_v35 = vld [vmem:[#allocation6 + $0x28] sm:$0xff]   ;;  %v912_v37 = vld [vmem:[#allocation6 + $0x30] sm:$0xff]   ;;  %s518_s27 = sadd.s32 1, %s1023_s15 }
  0x53   : > { %s277_s13 = sand.u32 1, %s760_s12   ;;  %825 = vmatprep.mubr.bf16.mxu1 %v908_v25  ;;  %v913_v38 = vld [vmem:[#allocation6 + $0x18] sm:$0xff]   ;;  %v771_v40 = vld [vmem:[%s230_s8] ss:$0 sm:$0xff]  ;;  %p773_p9 = scmp.ge.s32.totalorder %s518_s27, 3 }
  0x54   : > { %s278_s14 = ssub.s32 0, %s277_s13  ;;  %v914_v39 = vld [vmem:[#allocation6 + $0x38] sm:$0xff]   ;;  %v772_v42 = vld [vmem:[%s233_s11] ss:$0 sm:$0xff] }
  0x55   : > { %s1346_s14 = smov (!%p274_p4, %s278_s14), %s277_s13 }
  0x56   : > { %s783_s22 = sshll.u32 %s1346_s14, 6  ;;  %s531_s5 = ssub.s32 (!%p773_p9), 1, %s1346_s14 }
  0x57   : > { %s1184_s25 = scalar_lea.vmem [#allocation2], %s783_s22  ;;  %s784_s6 = sshll.u32 (!%p773_p9), %s531_s5, 6 }
  0x58   : > { %v283_v26 = vld [vmem:[%s1184_s25] sm:$0xff]  ;;  %v284_v27 = vld [vmem:[%s1184_s25 + $0x8] sm:$0xff]  ;;  %v285_v28 = vld [vmem:[%s1184_s25 + $0x10] sm:$0xff]  ;;  %s537_s7 = scalar_lea.vmem (!%p773_p9), [#allocation2], %s784_s6 }
  0x59   : > { %801 = vmatprep.subr.bf16.mxu0 %v283_v26  ;;  %833 = vmatprep.subr.bf16.mxu1 %v283_v26  ;;  %v286_v29 = vld [vmem:[%s1184_s25 + $0x18] sm:$0xff]  ;;  %v287_v30 = vld [vmem:[%s1184_s25 + $0x20] sm:$0xff]  ;;  %v288_v31 = vld [vmem:[%s1184_s25 + $0x28] sm:$0xff] }
  0x5a   : > { %802 = vmatpush3.bf16.msra.mxu0 %v283_v26  ;;  %841 = vmatpush3.bf16.msra.mxu1 %v283_v26  ;;  %v289_v32 = vld [vmem:[%s1184_s25 + $0x30] sm:$0xff]  ;;  %v290_v33 = vld [vmem:[%s1184_s25 + $0x38] sm:$0xff] }
  0x5b   : > { %803 = vmatprep.subr.bf16.mxu0 %v284_v27  ;;  %834 = vmatprep.subr.bf16.mxu1 %v284_v27 }
  0x5e   : > { %804 = vmatpush3.bf16.msra.mxu0 %v284_v27  ;;  %842 = vmatpush3.bf16.msra.mxu1 %v284_v27 }
  0x5f   : > { %805 = vmatprep.subr.bf16.mxu0 %v285_v28  ;;  %835 = vmatprep.subr.bf16.mxu1 %v285_v28 }
  0x62   : > { %806 = vmatpush3.bf16.msra.mxu0 %v285_v28  ;;  %843 = vmatpush3.bf16.msra.mxu1 %v285_v28 }
  0x63   : > { %807 = vmatprep.subr.bf16.mxu0 %v286_v29  ;;  %836 = vmatprep.subr.bf16.mxu1 %v286_v29 }
  0x66   : > { %808 = vmatpush3.bf16.msra.mxu0 %v286_v29  ;;  %844 = vmatpush3.bf16.msra.mxu1 %v286_v29 }
  0x67   : > { %809 = vmatprep.subr.bf16.mxu0 %v287_v30  ;;  %837 = vmatprep.subr.bf16.mxu1 %v287_v30 }
  0x6a   : > { %810 = vmatpush3.bf16.msra.mxu0 %v287_v30  ;;  %845 = vmatpush3.bf16.msra.mxu1 %v287_v30 }
  0x6b   : > { %811 = vmatprep.subr.bf16.mxu0 %v288_v31  ;;  %838 = vmatprep.subr.bf16.mxu1 %v288_v31 }
  0x6e   : > { %812 = vmatpush3.bf16.msra.mxu0 %v288_v31  ;;  %846 = vmatpush3.bf16.msra.mxu1 %v288_v31 }
  0x6f   : > { %813 = vmatprep.subr.bf16.mxu0 %v289_v32  ;;  %839 = vmatprep.subr.bf16.mxu1 %v289_v32 }
  0x72   : > { %814 = vmatpush3.bf16.msra.mxu0 %v289_v32  ;;  %847 = vmatpush3.bf16.msra.mxu1 %v289_v32 }
  0x73   : > { %815 = vmatprep.subr.bf16.mxu0 %v290_v33  ;;  %840 = vmatprep.subr.bf16.mxu1 %v290_v33 }
  0x76   : > { %816 = vmatpush3.bf16.msra.mxu0 %v290_v33  ;;  %848 = vmatpush3.bf16.msra.mxu1 %v290_v33 }
  0x79   : > { %818 = vmatmul.mubr.bf16.vlgmr.msra.gmra.mrb[0].mxu0 %v909_v34  ;;  %826 = vmatmul.mubr.bf16.vlgmr.msra.gmra.mrb[0].mxu1 %v910_v35 }
  0x7a   : > { %821 = vmatprep.mubr.bf16.mxu0 %v911_v36  ;;  %829 = vmatprep.mubr.bf16.mxu1 %v912_v37 }
  0x81   : > { %822 = vmatmul.mubr.bf16.gmra.mrb[4].mxu0 %v913_v38  ;;  %830 = vmatmul.mubr.bf16.gmra.mrb[4].mxu1 %v914_v39 }
 0x14c   : > { %v819_v41 = vpop.f32.mrb[0].mxu0  ;;  %v827_v43 = vpop.f32.mrb[0].mxu1 }
 0x14d   : > { %v465_v44 = vmul.f32 %v819_v41, %v771_v40  ;;  %v473_v45 = vmul.f32 %v827_v43, %v771_v40  ;;  %v393_v46 = vpop.f32.mrb[1].mxu0  ;;  %v425_v47 = vpop.f32.mrb[1].mxu1 }
 0x14e   : > { %v463_v48 = vmul.f32 %v771_v40, %v393_v46  ;;  %v471_v49 = vmul.f32 %v771_v40, %v425_v47  ;;  %v820_v50 = vpop.f32.mrb[2].mxu0  ;;  %v828_v51 = vpop.f32.mrb[2].mxu1 }
 0x14f   : > { %v488_v52 = vadd.f32 %v772_v42, %v465_v44  ;;  %v496_v53 = vadd.f32 %v772_v42, %v473_v45  ;;  %v466_v54 = vmul.f32 %v820_v50, %v771_v40  ;;  %v474_v55 = vmul.f32 %v828_v51, %v771_v40  ;;  %v396_v56 = vpop.f32.mrb[3].mxu0  ;;  %v428_v57 = vpop.f32.mrb[3].mxu1 }
 0x150   : > { %v486_v58 = vadd.f32 %v772_v42, %v463_v48  ;;  %v494_v59 = vadd.f32 %v772_v42, %v471_v49  ;;  %v464_v60 = vmul.f32 %v771_v40, %v396_v56  ;;  %v472_v61 = vmul.f32 %v771_v40, %v428_v57 }
 0x151   : > { %v1205_v62 = vmax.f32 %v488_v52, 0.0  ;;  %v1207_v63 = vmax.f32 %v496_v53, 0.0  ;;  %v489_v0 = vadd.f32 %v772_v42, %v466_v54  ;;  %v497_v1 = vadd.f32 %v772_v42, %v474_v55 }
 0x152   : > { %v1209_v2 = vmax.f32 %v486_v58, 0.0  ;;  %v1211_v3 = vmax.f32 %v494_v59, 0.0  ;;  %v487_v4 = vadd.f32 %v772_v42, %v464_v60  ;;  %v495_v5 = vadd.f32 %v772_v42, %v472_v61 }
 0x153   : > { %v1213_v6 = vmax.f32 %v489_v0, 0.0  ;;  %v1215_v7 = vmax.f32 %v497_v1, 0.0 }
 0x154   : > { %v1217_v8 = vmax.f32 %v487_v4, 0.0  ;;  %v1219_v9 = vmax.f32 %v495_v5, 0.0  ;;  %v823_v10 = vpop.f32.mrb[4].mxu0  ;;  %v831_v11 = vpop.f32.mrb[4].mxu1 }
 0x155   : > { %v469_v12 = vmul.f32 %v823_v10, %v771_v40  ;;  %v477_v13 = vmul.f32 %v831_v11, %v771_v40  ;;  %v409_v14 = vpop.f32.mrb[5].mxu0  ;;  %v441_v15 = vpop.f32.mrb[5].mxu1  ;;  %v528_v47 = vpack.c.bf16 (!%p773_p9), %v1215_v7, %v1207_v63 }
 0x156   : > { %v467_v16 = vmul.f32 %v771_v40, %v409_v14  ;;  %v475_v17 = vmul.f32 %v771_v40, %v441_v15  ;;  %v824_v18 = vpop.f32.mrb[6].mxu0  ;;  %v832_v19 = vpop.f32.mrb[6].mxu1  ;;  %522 = sbr.rel (%p773_p9) target bundleno = 353 (0x161), region = 52  ;;  %v527_v46 = vpack.c.bf16 (!%p773_p9), %v1219_v9, %v1211_v3 }
 0x157   : > { %v492_v20 = vadd.f32 %v772_v42, %v469_v12  ;;  %v500_v21 = vadd.f32 %v772_v42, %v477_v13  ;;  %v470_v22 = vmul.f32 %v824_v18, %v771_v40  ;;  %v478_v23 = vmul.f32 %v832_v19, %v771_v40  ;;  %v412_v24 = vpop.f32.mrb[7].mxu0  ;;  %v444_v25 = vpop.f32.mrb[7].mxu1  ;;  %543 = vst [vmem:[%s537_s7 + $0x28] sm:$0xff] (!%p773_p9), %v528_v47 }
 0x158   : > { %v490_v26 = vadd.f32 %v772_v42, %v467_v16  ;;  %v498_v27 = vadd.f32 %v772_v42, %v475_v17  ;;  %v468_v28 = vmul.f32 %v771_v40, %v412_v24  ;;  %v476_v29 = vmul.f32 %v771_v40, %v444_v25  ;;  %542 = vst [vmem:[%s537_s7 + $0x20] sm:$0xff] (!%p773_p9), %v527_v46 }
 0x159   : > { %v1221_v30 = vmax.f32 %v492_v20, 0.0  ;;  %v1223_v31 = vmax.f32 %v500_v21, 0.0  ;;  %v493_v32 = vadd.f32 %v772_v42, %v470_v22  ;;  %v501_v33 = vadd.f32 %v772_v42, %v478_v23 }
 0x15a   : > { %v1225_v34 = vmax.f32 %v490_v26, 0.0  ;;  %v1227_v35 = vmax.f32 %v498_v27, 0.0  ;;  %v491_v36 = vadd.f32 %v772_v42, %v468_v28  ;;  %v499_v37 = vadd.f32 %v772_v42, %v476_v29 }
 0x15b   : > { %v1229_v38 = vmax.f32 %v493_v32, 0.0  ;;  %v1231_v39 = vmax.f32 %v501_v33, 0.0  ;;  %v523_v40 = vpack.c.bf16 (!%p773_p9), %v1217_v8, %v1209_v2  ;;  %v524_v42 = vpack.c.bf16 (!%p773_p9), %v1213_v6, %v1205_v62 }
 0x15c   : > { %v1233_v41 = vmax.f32 %v491_v36, 0.0  ;;  %v1235_v43 = vmax.f32 %v499_v37, 0.0 }
 0x15d   : > { %v526_v45 = vpack.c.bf16 %v1229_v38, %v1221_v30  ;;  %v530_v49 = vpack.c.bf16 %v1231_v39, %v1223_v31  ;;  %538 = vst [vmem:[%s537_s7] sm:$0xff] %v523_v40  ;;  %539 = vst [vmem:[%s537_s7 + $0x8] sm:$0xff] %v524_v42 }
 0x15e   : > { %v525_v44 = vpack.c.bf16 %v1233_v41, %v1225_v34  ;;  %v529_v48 = vpack.c.bf16 %v1235_v43, %v1227_v35 }
 0x15f   : > { %541 = vst [vmem:[%s537_s7 + $0x18] sm:$0xff] %v526_v45  ;;  %545 = vst [vmem:[%s537_s7 + $0x38] sm:$0xff] %v530_v49 }
 0x160   : > { %540 = vst [vmem:[%s537_s7 + $0x10] sm:$0xff] %v525_v44  ;;  %544 = vst [vmem:[%s537_s7 + $0x30] sm:$0xff] %v529_v48 }
 0x161 PF: > { %p776_p10 = scmp.ne.s32.totalorder %s1023_s15, 0 }
 0x162   : > { %v550_v50 = vld [vmem:[#allocation3] sm:$0xff] (!%p776_p10)  ;;  %v551_v51 = vld [vmem:[#allocation3 + $0x8] sm:$0xff] (!%p776_p10)  ;;  %v552_v52 = vld [vmem:[#allocation3 + $0x10] sm:$0xff] (!%p776_p10) }
 0x163   : > { %548 = sbr.rel (%p776_p10) target bundleno = 365 (0x16d), region = 56  ;;  %v566_v53 = vadd.f32 (!%p776_p10), %v550_v50, %v1209_v2  ;;  %v567_v54 = vadd.f32 (!%p776_p10), %v551_v51, %v1217_v8  ;;  %v568_v55 = vadd.f32 (!%p776_p10), %v552_v52, %v1205_v62  ;;  %v553_v56 = vld [vmem:[#allocation3 + $0x18] sm:$0xff] (!%p776_p10)  ;;  %v554_v57 = vld [vmem:[#allocation3 + $0x20] sm:$0xff] (!%p776_p10)  ;;  %v555_v58 = vld [vmem:[#allocation3 + $0x28] sm:$0xff] (!%p776_p10) }
 0x164   : > { %v569_v59 = vadd.f32 (!%p776_p10), %v553_v56, %v1213_v6  ;;  %v570_v60 = vadd.f32 (!%p776_p10), %v554_v57, %v1225_v34  ;;  %v571_v61 = vadd.f32 (!%p776_p10), %v555_v58, %v1233_v41  ;;  %v556_v0 = vld [vmem:[#allocation3 + $0x30] sm:$0xff] (!%p776_p10)  ;;  %v557_v1 = vld [vmem:[#allocation3 + $0x38] sm:$0xff] (!%p776_p10)  ;;  %v558_v4 = vld [vmem:[#allocation3 + $0x40] sm:$0xff] (!%p776_p10) }
 0x165   : > { %583 = vst [vmem:[#allocation8] sm:$0xff] (!%p776_p10), %v566_v53  ;;  %584 = vst [vmem:[#allocation8 + $0x8] sm:$0xff] (!%p776_p10), %v567_v54  ;;  %v572_v5 = vadd.f32 (!%p776_p10), %v556_v0, %v1221_v30  ;;  %v573_v10 = vadd.f32 (!%p776_p10), %v557_v1, %v1229_v38  ;;  %v574_v11 = vadd.f32 (!%p776_p10), %v558_v4, %v1211_v3  ;;  %v559_v12 = vld [vmem:[#allocation3 + $0x48] sm:$0xff] (!%p776_p10)  ;;  %v560_v13 = vld [vmem:[#allocation3 + $0x50] sm:$0xff] (!%p776_p10) }
 0x166   : > { %585 = vst [vmem:[#allocation8 + $0x10] sm:$0xff] (!%p776_p10), %v568_v55  ;;  %v561_v14 = vld [vmem:[#allocation3 + $0x58] sm:$0xff] (!%p776_p10)  ;;  %586 = vst [vmem:[#allocation8 + $0x18] sm:$0xff] (!%p776_p10), %v569_v59  ;;  %v575_v15 = vadd.f32 (!%p776_p10), %v559_v12, %v1219_v9  ;;  %v576_v16 = vadd.f32 (!%p776_p10), %v560_v13, %v1207_v63  ;;  %v562_v18 = vld [vmem:[#allocation3 + $0x60] sm:$0xff] (!%p776_p10) }
 0x167   : > { %587 = vst [vmem:[#allocation8 + $0x20] sm:$0xff] (!%p776_p10), %v570_v60  ;;  %588 = vst [vmem:[#allocation8 + $0x28] sm:$0xff] (!%p776_p10), %v571_v61  ;;  %v577_v17 = vadd.f32 (!%p776_p10), %v561_v14, %v1215_v7  ;;  %v563_v19 = vld [vmem:[#allocation3 + $0x68] sm:$0xff] (!%p776_p10)  ;;  %v564_v20 = vld [vmem:[#allocation3 + $0x70] sm:$0xff] (!%p776_p10)  ;;  %v578_v21 = vadd.f32 (!%p776_p10), %v562_v18, %v1227_v35 }
 0x168   : > { %589 = vst [vmem:[#allocation8 + $0x30] sm:$0xff] (!%p776_p10), %v572_v5  ;;  %590 = vst [vmem:[#allocation8 + $0x38] sm:$0xff] (!%p776_p10), %v573_v10  ;;  %v579_v22 = vadd.f32 (!%p776_p10), %v563_v19, %v1235_v43  ;;  %v580_v23 = vadd.f32 (!%p776_p10), %v564_v20, %v1223_v31  ;;  %v565_v24 = vld [vmem:[#allocation3 + $0x78] sm:$0xff] (!%p776_p10) }
 0x169   : > { %591 = vst [vmem:[#allocation8 + $0x40] sm:$0xff] (!%p776_p10), %v574_v11  ;;  %592 = vst [vmem:[#allocation8 + $0x48] sm:$0xff] (!%p776_p10), %v575_v15  ;;  %v581_v25 = vadd.f32 (!%p776_p10), %v565_v24, %v1231_v39 }
 0x16a   : > { %593 = vst [vmem:[#allocation8 + $0x50] sm:$0xff] %v576_v16  ;;  %594 = vst [vmem:[#allocation8 + $0x58] sm:$0xff] %v577_v17 }
 0x16b   : > { %595 = vst [vmem:[#allocation8 + $0x60] sm:$0xff] %v578_v21  ;;  %596 = vst [vmem:[#allocation8 + $0x68] sm:$0xff] %v579_v22 }
 0x16c   : > { %597 = vst [vmem:[#allocation8 + $0x70] sm:$0xff] %v580_v23  ;;  %598 = vst [vmem:[#allocation8 + $0x78] sm:$0xff] %v581_v25 }
 0x16d PF: > { %p777_p11 = scmp.le.s32.totalorder %s1023_s15, 0 }
 0x16f   : > { %602 = sbr.rel (%p777_p11) target bundleno = 379 (0x17b), region = 60  ;;  %v604_v26 = vld [vmem:[#allocation8] sm:$0xff] (!%p777_p11)  ;;  %v605_v27 = vld [vmem:[#allocation8 + $0x8] sm:$0xff] (!%p777_p11) }
 0x170   : > { %v606_v28 = vld [vmem:[#allocation8 + $0x10] sm:$0xff] (!%p777_p11)  ;;  %v620_v29 = vadd.f32 (!%p777_p11), %v604_v26, %v1209_v2  ;;  %v621_v32 = vadd.f32 (!%p777_p11), %v605_v27, %v1217_v8  ;;  %v607_v36 = vld [vmem:[#allocation8 + $0x18] sm:$0xff] (!%p777_p11) }
 0x171   : > { %v622_v33 = vadd.f32 (!%p777_p11), %v606_v28, %v1205_v62  ;;  %v608_v37 = vld [vmem:[#allocation8 + $0x20] sm:$0xff] (!%p777_p11)  ;;  %v609_v40 = vld [vmem:[#allocation8 + $0x28] sm:$0xff] (!%p777_p11)  ;;  %v623_v42 = vadd.f32 (!%p777_p11), %v607_v36, %v1213_v6 }
 0x172   : > { %v624_v44 = vadd.f32 (!%p777_p11), %v608_v37, %v1225_v34  ;;  %v625_v45 = vadd.f32 (!%p777_p11), %v609_v40, %v1233_v41  ;;  %v610_v46 = vld [vmem:[#allocation8 + $0x30] sm:$0xff] (!%p777_p11)  ;;  %v611_v47 = vld [vmem:[#allocation8 + $0x38] sm:$0xff] (!%p777_p11)  ;;  %636 = vst [vmem:[#allocation8] sm:$0xff] (!%p777_p11), %v620_v29  ;;  %637 = vst [vmem:[#allocation8 + $0x8] sm:$0xff] (!%p777_p11), %v621_v32 }
 0x173   : > { %v612_v48 = vld [vmem:[#allocation8 + $0x40] sm:$0xff] (!%p777_p11)  ;;  %638 = vst [vmem:[#allocation8 + $0x10] sm:$0xff] (!%p777_p11), %v622_v33  ;;  %v626_v2 = vadd.f32 (!%p777_p11), %v610_v46, %v1221_v30  ;;  %v627_v8 = vadd.f32 (!%p777_p11), %v611_v47, %v1229_v38  ;;  %v613_v49 = vld [vmem:[#allocation8 + $0x48] sm:$0xff] (!%p777_p11)  ;;  %639 = vst [vmem:[#allocation8 + $0x18] sm:$0xff] (!%p777_p11), %v623_v42 }
 0x174   : > { %v628_v62 = vadd.f32 (!%p777_p11), %v612_v48, %v1211_v3  ;;  %v614_v50 = vld [vmem:[#allocation8 + $0x50] sm:$0xff] (!%p777_p11)  ;;  %v615_v51 = vld [vmem:[#allocation8 + $0x58] sm:$0xff] (!%p777_p11)  ;;  %640 = vst [vmem:[#allocation8 + $0x20] sm:$0xff] (!%p777_p11), %v624_v44  ;;  %641 = vst [vmem:[#allocation8 + $0x28] sm:$0xff] (!%p777_p11), %v625_v45  ;;  %v629_v6 = vadd.f32 (!%p777_p11), %v613_v49, %v1219_v9 }
 0x175   : > { %v630_v34 = vadd.f32 (!%p777_p11), %v614_v50, %v1207_v63  ;;  %v631_v41 = vadd.f32 (!%p777_p11), %v615_v51, %v1215_v7  ;;  %v616_v52 = vld [vmem:[#allocation8 + $0x60] sm:$0xff] (!%p777_p11)  ;;  %v617_v53 = vld [vmem:[#allocation8 + $0x68] sm:$0xff] (!%p777_p11)  ;;  %v618_v54 = vld [vmem:[#allocation8 + $0x70] sm:$0xff] (!%p777_p11)  ;;  %642 = vst [vmem:[#allocation8 + $0x30] sm:$0xff] (!%p777_p11), %v626_v2 }
 0x176   : > { %643 = vst [vmem:[#allocation8 + $0x38] sm:$0xff] %v627_v8  ;;  %644 = vst [vmem:[#allocation8 + $0x40] sm:$0xff] %v628_v62  ;;  %v632_v3 = vadd.f32 %v616_v52, %v1227_v35  ;;  %v633_v30 = vadd.f32 %v617_v53, %v1235_v43  ;;  %v634_v38 = vadd.f32 %v618_v54, %v1223_v31  ;;  %v619_v55 = vld [vmem:[#allocation8 + $0x78] sm:$0xff] }
 0x177   : > { %645 = vst [vmem:[#allocation8 + $0x48] sm:$0xff] %v629_v6  ;;  %646 = vst [vmem:[#allocation8 + $0x50] sm:$0xff] %v630_v34  ;;  %v635_v63 = vadd.f32 %v619_v55, %v1231_v39 }
 0x178   : > { %647 = vst [vmem:[#allocation8 + $0x58] sm:$0xff] %v631_v41  ;;  %648 = vst [vmem:[#allocation8 + $0x60] sm:$0xff] %v632_v3 }
 0x179   : > { %649 = vst [vmem:[#allocation8 + $0x68] sm:$0xff] %v633_v30  ;;  %650 = vst [vmem:[#allocation8 + $0x70] sm:$0xff] %v634_v38 }
 0x17a   : > { %651 = vst [vmem:[#allocation8 + $0x78] sm:$0xff] %v635_v63 }
 0x17b PF: > { %p1292_p12 = scmp.eq.s32.totalorder %s751_s18, 2  ;;  %s1039_s24 = smov [#allocation8]  }
 0x17c   : > { %s658_s20 = sshll.u32 %s1039_s24, 4  ;;  %s659_s20 = int_to_ptr.vmem [resolvable:$true] %s658_s20 }
 0x17d   : > { %s971_s26 = scalar_lea.vmem %s659_s20, 2048  ;;  %p978_p2 = scmp.lt.s32.totalorder %s659_s20, %s659_s20 }
 0x17e   : > { %p972_p13 = scmp.ne.s32.totalorder %s659_s20, %s971_s26  ;;  %p979_p5 = scmp.lt.s32.totalorder %s971_s26, %s971_s26 }
 0x180   : > { %p973_p0 = pnand %p972_p13, %p1292_p12  ;;  %p980_p7 = por %p979_p5, %p978_p2 }
 0x182   : > { %p974_p1 = pneg %p973_p0 }
 0x184   : > { %p981_p8 = pnand %p980_p7, %p974_p1 }
 0x186   : > { %984 = shalt.err (!%p981_p8)
}
 0x187   : > { %s985_s18 = scalar_lea.hbm %s1331_s4, 2048 }
 0x188   : > { %p986_p3 = scmp.ne.s32.totalorder %s1331_s4, %s985_s18  ;;  %p991_p9 = scmp.lt.u32.totalorder %s985_s18, %s1331_s4 }
 0x18a   : > { %p987_p6 = pnand %p986_p3, %p1292_p12 }
 0x18c   : > { %p988_p4 = pneg %p987_p6 }
 0x18e   : > { %p993_p10 = pnand %p991_p9, %p988_p4 }
 0x190   : > { %996 = shalt.err (!%p993_p10)
}
 0x191   : > { %s1040_s13 = smov 128   ;;  %s1041_s14 = smov 8  }
 0x192   : > { %858 = dma.vmem_to_hbm [thread:$0]  (%p1292_p12), %s659_s20, 2048, %s1331_s4, [#allocation5], %s1040_s13, %s1040_s13, %s1041_s14  }
 0x193   : > { %1018 = dma.done.wait (%p1292_p12), [#allocation5], 2048  }
 0x194   : > { %1020 = vsyncadd (%p1292_p12), [#allocation5], 4294965248 }
 0x195 PF: > { %s17_s17 = sadd.s32 1, %s1031_s17   ;;  %s1341_s15 = smov %s1027_s16 }
 0x196   : > { %p14_p11 = scmp.ge.s32.totalorder %s17_s17, 5   ;;  %s1342_s16 = smov %s1344_s19 }
 0x198   :  { %16 = sbr.rel (!%p14_p11) target bundleno = 4 (0x4), region = 97 }
 0x19f   :  { %674 = vsyncpa [#allocation4], 1 }
 0x1a0   :  { %676 = vsyncpa [#allocation4 + $0x1], 1 }
 0x1a1   :  { %677 = vsyncpa [#allocation7], 1 }
 0x1a2   :  { %678 = vsyncpa [#allocation5], 1 }
 0x1a3   :  { %680 = vsyncpa [#allocation5 + $0x1], 1 }

</bundles_post_ra>
